<compile_context>
chip_gen: v7x
topology: tpu7x:2x2x1
jax: 0.10.0
libtpu: 0.0.40
codegen_flags: <defaults>
</compile_context>

<pallas_src>
import functools

import jax
import jax.numpy as jnp
from jax import lax
from jax.experimental import pallas as pl
from jax.experimental.pallas import tpu as pltpu

# Receptive field of two stacked kernel_size=3, dilation=1 convs is 5 -> halo of 2 per side.
HALO = 2


def _residual_block_kernel(x_ref, w1_ref, w2_ref, wres_ref, aff_ref, o_ref,
                           *, K, TL, L, compute_dtype):
    # x_ref   : (1, L + 2*HALO, Cin)  zero-padded full sequence, resident per batch
    # w1_ref  : (K*Cin, F)            im2col-flattened conv1 weight
    # w2_ref  : (K*F,  F)             im2col-flattened conv2 weight
    # wres_ref: (Cin, F)              1x1 residual projection weight
    # aff_ref : (5, F)                rows = [s1, b1, s2, b2, bres] (folded eval-mode BN)
    # o_ref   : (1, TL, F)            output tile
    j = pl.program_id(1)
    start = pl.multiple_of(j * TL, 8)          # tile window start in padded coordinates

    aff = aff_ref[...]                          # (5, F) f32
    s1, b1 = aff[0:1], aff[1:2]
    s2, b2 = aff[2:3], aff[3:4]
    bres = aff[4:5]

    # Window covering the 5-wide receptive field of this output tile:
    # padded positions [j*TL, j*TL + TL + 4)  ==  original positions [j*TL - 2, j*TL + TL + 2).
    xw = x_ref[0, pl.ds(start, TL + 2 * HALO), :].astype(compute_dtype)     # (TL+4, Cin)

    # ---- My_Conv1d #1: conv(k=3, 'same') as a single im2col matmul -> BN affine -> ReLU.
    cols1 = jnp.concatenate([xw[t:t + TL + 2] for t in range(K)], axis=-1)  # (TL+2, K*Cin)
    h = jnp.dot(cols1, w1_ref[...].astype(compute_dtype),
                preferred_element_type=jnp.float32)                         # (TL+2, F)
    h = jnp.maximum(h * s1 + b1, 0.0)

    # Zero the halo rows that fall outside [0, L): conv2's 'same' padding pads the *activation*
    # h with zeros; it is NOT conv1 applied to zero-padded x.
    orig = (j * TL - 1) + lax.broadcasted_iota(jnp.int32, (TL + 2, 1), 0)
    h = jnp.where((orig >= 0) & (orig < L), h, 0.0)

    # ---- My_Conv1d #2: same im2col trick on the (TL+2, F) activation window.
    hc = h.astype(compute_dtype)
    cols2 = jnp.concatenate([hc[t:t + TL] for t in range(K)], axis=-1)      # (TL, K*F)
    y = jnp.dot(cols2, w2_ref[...].astype(compute_dtype),
                preferred_element_type=jnp.float32)                         # (TL, F)
    y = jnp.maximum(y * s2 + b2, 0.0)

    # ---- residual: 1x1 Conv1d projection on the un-shifted rows of this tile.
    res = jnp.dot(xw[HALO:HALO + TL], wres_ref[...].astype(compute_dtype),
                  preferred_element_type=jnp.float32) + bres                # (TL, F)

    # residual_type == 'sum'
    o_ref[0] = (y + res).astype(o_ref.dtype)


def residual_block(x_nlc, params, *, tile_l=None, compute_dtype=jnp.float32):
    """x_nlc: (N, L, Cin) float32. Returns (N, L, F) float32."""
    N, L, Cin = x_nlc.shape
    K, _, F = params["w1"].shape

    if tile_l is None:
        tile_l = min(L, 512)                    # biggest tile that comfortably fits VMEM
    assert L % tile_l == 0, "demo wrapper requires L % tile_l == 0"
    assert tile_l % 8 == 0, "tile_l must be a multiple of 8 (sublane tiling)"

    # Zero-pad the sequence by the halo so boundary tiles read zeros (conv1 'same' padding).
    x_pad = jnp.pad(x_nlc, ((0, 0), (HALO, HALO), (0, 0)))
    Lp = L + 2 * HALO

    # im2col-flattened weights and packed affine table (parameter prep, done once).
    w1_flat = params["w1"].reshape(K * Cin, F).astype(compute_dtype)
    w2_flat = params["w2"].reshape(K * F, F).astype(compute_dtype)
    wres = params["wres"].astype(compute_dtype)
    aff = jnp.concatenate([params["s1"], params["b1"], params["s2"],
                           params["b2"], params["bres"]], axis=0)            # (5, F) f32

    kernel = functools.partial(_residual_block_kernel,
                               K=K, TL=tile_l, L=L, compute_dtype=compute_dtype)

    grid_spec = pltpu.PrefetchScalarGridSpec(
        num_scalar_prefetch=0,
        grid=(N, L // tile_l),
        in_specs=[
            # Padded input: block index is constant along the L-tile axis, so the slab is
            # fetched once per batch and stays resident; the kernel slices its halo window.
            pl.BlockSpec((1, Lp, Cin), lambda n, j: (n, 0, 0)),
            pl.BlockSpec((K * Cin, F), lambda n, j: (0, 0)),     # w1 (im2col-flat)
            pl.BlockSpec((K * F, F),   lambda n, j: (0, 0)),     # w2 (im2col-flat)
            pl.BlockSpec((Cin, F),     lambda n, j: (0, 0)),     # wres (1x1 conv)
            pl.BlockSpec((5, F),       lambda n, j: (0, 0)),     # packed [s1,b1,s2,b2,bres]
        ],
        out_specs=pl.BlockSpec((1, tile_l, F), lambda n, j: (n, j, 0)),
    )

    return pl.pallas_call(
        kernel,
        out_shape=jax.ShapeDtypeStruct((N, L, F), jnp.float32),
        grid_spec=grid_spec,
        compiler_params=pltpu.CompilerParams(
            # No cross-tile accumulation (halo carried in the input slab), so both axes are
            # freely shardable across megacore TensorCores.
            dimension_semantics=("parallel", "parallel"),
            # Above v5e's 16 MiB default scoped limit; leaves headroom under v7x's 64 MiB.
            vmem_limit_bytes=32 * 1024 * 1024,
        ),
    )(x_pad, w1_flat, w2_flat, wres, aff)


def reference_forward(x_nlc, params):
    """Pure-JAX reference with identical semantics (for verification)."""
    def conv_same(x, w):
        K = w.shape[0]
        pad = (K - 1) // 2
        L = x.shape[1]
        xp = jnp.pad(x, ((0, 0), (pad, pad), (0, 0)))
        return sum(jnp.einsum("nlc,cf->nlf", xp[:, t:t + L], w[t]) for t in range(K))

    h = jax.nn.relu(conv_same(x_nlc, params["w1"]) * params["s1"] + params["b1"])
    h = jax.nn.relu(conv_same(h, params["w2"]) * params["s2"] + params["b2"])
    res = jnp.einsum("nlc,cf->nlf", x_nlc, params["wres"]) + params["bres"]
    return h + res


def make_params(key, in_channels, feature_size, kernel_size=3):
    """Deterministic synthetic parameters (shapes from Residual_Block.__init__)."""
    ks = jax.random.split(key, 8)
    # Conv weights stored as (K, Cin, Cout)  (PyTorch Conv1d weight (Cout, Cin, K) transposed).
    w1 = 0.1 * jax.random.normal(ks[0], (kernel_size, in_channels, feature_size), jnp.float32)
    w2 = 0.1 * jax.random.normal(ks[1], (kernel_size, feature_size, feature_size), jnp.float32)
    # Folded eval-mode BatchNorm1d (+ conv bias): per-channel scale and bias, shape (1, F).
    s1 = 1.0 + 0.05 * jax.random.normal(ks[2], (1, feature_size), jnp.float32)
    b1 = 0.05 * jax.random.normal(ks[3], (1, feature_size), jnp.float32)
    s2 = 1.0 + 0.05 * jax.random.normal(ks[4], (1, feature_size), jnp.float32)
    b2 = 0.05 * jax.random.normal(ks[5], (1, feature_size), jnp.float32)
    # Residual 1x1 Conv1d: weight (Cin, F) + bias (1, F).
    wres = 0.1 * jax.random.normal(ks[6], (in_channels, feature_size), jnp.float32)
    bres = 0.05 * jax.random.normal(ks[7], (1, feature_size), jnp.float32)
    return {"w1": w1, "s1": s1, "b1": b1, "w2": w2, "s2": s2, "b2": b2,
            "wres": wres, "bres": bres}


if __name__ == "__main__":
    # Small shapes: batch=2, seq_len=64, in_channels=8, feature_size=16, L-tile=16
    # (in_channels != feature_size -> residual path is a 1x1 Conv1d, as in the module;
    #  4 L-tiles per batch exercise the halo/boundary-masking logic).
    N, L, C_IN, FEAT, TL = 2, 64, 8, 16, 16

    key = jax.random.PRNGKey(0)
    kx, kp = jax.random.split(key)
    # PyTorch input would be (N, C_IN, L); kernel layout is (N, L, C_IN).
    x_ncl = jax.random.normal(kx, (N, C_IN, L), jnp.float32)
    x_nlc = jnp.transpose(x_ncl, (0, 2, 1))

    params = make_params(kp, C_IN, FEAT)

    # TODO(synk): SENet_r / ECA_Net channel-attention branches are disabled in the default
    # config (SENet_r=None, ECA_Net=False) and are not implemented here.
    # (Use compute_dtype=jnp.bfloat16 on v6e/v7x if the conv becomes compute-bound.)
    out = residual_block(x_nlc, params, tile_l=TL, compute_dtype=jnp.float32)
    out = jax.block_until_ready(out)

    ref = reference_forward(x_nlc, params)
    assert out.shape == (N, L, FEAT)
    assert jnp.allclose(out, ref, atol=1e-4, rtol=1e-4), "Pallas kernel mismatch vs reference"

    print("KERNEL_OK")
</pallas_src>

<mosaic_0001>
module attributes {stable_mosaic.version = 11 : i64} {
  func.func @_residual_block_kernel(%arg0: i32, %arg1: i32, %arg2: memref<1x68x8xf32, #tpu.memory_space<vmem>>, %arg3: memref<24x16xf32, #tpu.memory_space<vmem>>, %arg4: memref<48x16xf32, #tpu.memory_space<vmem>>, %arg5: memref<8x16xf32, #tpu.memory_space<vmem>>, %arg6: memref<5x16xf32, #tpu.memory_space<vmem>>, %arg7: memref<1x16x16xf32, #tpu.memory_space<vmem>>) attributes {dimension_semantics = [#tpu.dimension_semantics<parallel>, #tpu.dimension_semantics<parallel>], iteration_bounds = array<i64: 2, 4>, scalar_prefetch = 0 : i64, scratch_operands = 0 : i64, tpu.core_type = #tpu.core_type<tc>, window_params = [{transform_indices = @transform_0, window_bounds = array<i64: 1, 68, 8>}, {pipeline_mode = #tpu.pipeline_mode<synchronous>, transform_indices = @transform_1, window_bounds = array<i64: 24, 16>}, {pipeline_mode = #tpu.pipeline_mode<synchronous>, transform_indices = @transform_2, window_bounds = array<i64: 48, 16>}, {pipeline_mode = #tpu.pipeline_mode<synchronous>, transform_indices = @transform_3, window_bounds = array<i64: 8, 16>}, {pipeline_mode = #tpu.pipeline_mode<synchronous>, transform_indices = @transform_4, window_bounds = array<i64: 5, 16>}, {transform_indices = @transform_5, window_bounds = array<i64: 1, 16, 16>}]} {
    %c16_i32 = arith.constant 16 : i32
    %0 = arith.muli %arg1, %c16_i32 : i32
    %1 = tpu.assume_multiple %0, 8 : i32
    %c0 = arith.constant 0 : index
    %c0_0 = arith.constant 0 : index
    %2 = vector.load %arg6[%c0, %c0_0] : memref<5x16xf32, #tpu.memory_space<vmem>>, vector<5x16xf32>
    %3 = vector.extract_strided_slice %2 {offsets = [0, 0], sizes = [1, 16], strides = [1, 1]} : vector<5x16xf32> to vector<1x16xf32>
    %4 = vector.extract_strided_slice %2 {offsets = [1, 0], sizes = [1, 16], strides = [1, 1]} : vector<5x16xf32> to vector<1x16xf32>
    %5 = vector.extract_strided_slice %2 {offsets = [2, 0], sizes = [1, 16], strides = [1, 1]} : vector<5x16xf32> to vector<1x16xf32>
    %6 = vector.extract_strided_slice %2 {offsets = [3, 0], sizes = [1, 16], strides = [1, 1]} : vector<5x16xf32> to vector<1x16xf32>
    %7 = vector.extract_strided_slice %2 {offsets = [4, 0], sizes = [1, 16], strides = [1, 1]} : vector<5x16xf32> to vector<1x16xf32>
    %c0_1 = arith.constant 0 : index
    %8 = arith.index_cast %1 : i32 to index
    %c0_2 = arith.constant 0 : index
    %9 = vector.load %arg2[%c0_1, %8, %c0_2] : memref<1x68x8xf32, #tpu.memory_space<vmem>>, vector<1x20x8xf32>
    %10 = vector.shape_cast %9 : vector<1x20x8xf32> to vector<20x8xf32>
    %11 = vector.extract_strided_slice %10 {offsets = [0, 0], sizes = [18, 8], strides = [1, 1]} : vector<20x8xf32> to vector<18x8xf32>
    %12 = vector.extract_strided_slice %10 {offsets = [1, 0], sizes = [18, 8], strides = [1, 1]} : vector<20x8xf32> to vector<18x8xf32>
    %13 = vector.extract_strided_slice %10 {offsets = [2, 0], sizes = [18, 8], strides = [1, 1]} : vector<20x8xf32> to vector<18x8xf32>
    %14 = tpu.concatenate %11, %12, %13 in 1 : vector<18x8xf32>, vector<18x8xf32>, vector<18x8xf32> -> vector<18x24xf32>
    %c0_3 = arith.constant 0 : index
    %c0_4 = arith.constant 0 : index
    %15 = vector.load %arg3[%c0_3, %c0_4] : memref<24x16xf32, #tpu.memory_space<vmem>>, vector<24x16xf32>
    %cst = arith.constant dense<0.000000e+00> : vector<18x16xf32>
    %16 = tpu.matmul %14, %15, %cst {dimension_numbers = #tpu.dot_dimension_numbers<[1], [0], [0], [1], [0, 0, 1, 1], [], []>} : vector<18x24xf32>, vector<24x16xf32>, vector<18x16xf32> -> vector<18x16xf32>
    %17 = vector.broadcast %3 : vector<1x16xf32> to vector<18x16xf32>
    %18 = arith.mulf %16, %17 : vector<18x16xf32>
    %19 = vector.broadcast %4 : vector<1x16xf32> to vector<18x16xf32>
    %20 = arith.addf %18, %19 : vector<18x16xf32>
    %cst_5 = arith.constant 0.000000e+00 : f32
    %21 = vector.broadcast %cst_5 : f32 to vector<18x16xf32>
    %22 = arith.maximumf %20, %21 : vector<18x16xf32>
    %c16_i32_6 = arith.constant 16 : i32
    %23 = arith.muli %arg1, %c16_i32_6 : i32
    %c1_i32 = arith.constant 1 : i32
    %24 = arith.subi %23, %c1_i32 : i32
    %25 = tpu.iota {dimensions = array<i32: 0>} : vector<18x1xi32>
    %26 = vector.broadcast %24 : i32 to vector<18x1xi32>
    %27 = arith.addi %26, %25 : vector<18x1xi32>
    %c0_i32 = arith.constant 0 : i32
    %28 = vector.broadcast %c0_i32 : i32 to vector<18x1xi32>
    %29 = arith.cmpi sge, %27, %28 : vector<18x1xi32>
    %c64_i32 = arith.constant 64 : i32
    %30 = vector.broadcast %c64_i32 : i32 to vector<18x1xi32>
    %31 = arith.cmpi slt, %27, %30 : vector<18x1xi32>
    %32 = arith.andi %29, %31 : vector<18x1xi1>
    %cst_7 = arith.constant 0.000000e+00 : f32
    %33 = vector.shape_cast %32 : vector<18x1xi1> to vector<18x1xi1>
    %34 = vector.broadcast %33 : vector<18x1xi1> to vector<18x16xi1>
    %35 = vector.broadcast %cst_7 : f32 to vector<18x16xf32>
    %36 = arith.select %34, %22, %35 : vector<18x16xi1>, vector<18x16xf32>
    %37 = vector.extract_strided_slice %36 {offsets = [0, 0], sizes = [16, 16], strides = [1, 1]} : vector<18x16xf32> to vector<16x16xf32>
    %38 = vector.extract_strided_slice %36 {offsets = [1, 0], sizes = [16, 16], strides = [1, 1]} : vector<18x16xf32> to vector<16x16xf32>
    %39 = vector.extract_strided_slice %36 {offsets = [2, 0], sizes = [16, 16], strides = [1, 1]} : vector<18x16xf32> to vector<16x16xf32>
    %40 = tpu.concatenate %37, %38, %39 in 1 : vector<16x16xf32>, vector<16x16xf32>, vector<16x16xf32> -> vector<16x48xf32>
    %c0_8 = arith.constant 0 : index
    %c0_9 = arith.constant 0 : index
    %41 = vector.load %arg4[%c0_8, %c0_9] : memref<48x16xf32, #tpu.memory_space<vmem>>, vector<48x16xf32>
    %cst_10 = arith.constant dense<0.000000e+00> : vector<16x16xf32>
    %42 = tpu.matmul %40, %41, %cst_10 {dimension_numbers = #tpu.dot_dimension_numbers<[1], [0], [0], [1], [0, 0, 1, 1], [], []>} : vector<16x48xf32>, vector<48x16xf32>, vector<16x16xf32> -> vector<16x16xf32>
    %43 = vector.broadcast %5 : vector<1x16xf32> to vector<16x16xf32>
    %44 = arith.mulf %42, %43 : vector<16x16xf32>
    %45 = vector.broadcast %6 : vector<1x16xf32> to vector<16x16xf32>
    %46 = arith.addf %44, %45 : vector<16x16xf32>
    %cst_11 = arith.constant 0.000000e+00 : f32
    %47 = vector.broadcast %cst_11 : f32 to vector<16x16xf32>
    %48 = arith.maximumf %46, %47 : vector<16x16xf32>
    %49 = vector.extract_strided_slice %10 {offsets = [2, 0], sizes = [16, 8], strides = [1, 1]} : vector<20x8xf32> to vector<16x8xf32>
    %c0_12 = arith.constant 0 : index
    %c0_13 = arith.constant 0 : index
    %50 = vector.load %arg5[%c0_12, %c0_13] : memref<8x16xf32, #tpu.memory_space<vmem>>, vector<8x16xf32>
    %cst_14 = arith.constant dense<0.000000e+00> : vector<16x16xf32>
    %51 = tpu.matmul %49, %50, %cst_14 {dimension_numbers = #tpu.dot_dimension_numbers<[1], [0], [0], [1], [0, 0, 1, 1], [], []>} : vector<16x8xf32>, vector<8x16xf32>, vector<16x16xf32> -> vector<16x16xf32>
    %52 = vector.broadcast %7 : vector<1x16xf32> to vector<16x16xf32>
    %53 = arith.addf %51, %52 : vector<16x16xf32>
    %54 = arith.addf %48, %53 : vector<16x16xf32>
    %c0_15 = arith.constant 0 : index
    %c0_16 = arith.constant 0 : index
    %c0_17 = arith.constant 0 : index
    %55 = vector.load %arg7[%c0_15, %c0_16, %c0_17] : memref<1x16x16xf32, #tpu.memory_space<vmem>>, vector<1x16x16xf32>
    %56 = vector.shape_cast %55 : vector<1x16x16xf32> to vector<16x16xf32>
    %57 = vector.shape_cast %54 : vector<16x16xf32> to vector<1x16x16xf32>
    tpu.vector_store %arg7[%c0_15, %c0_16, %c0_17], %57 {strides = array<i32>} : memref<1x16x16xf32, #tpu.memory_space<vmem>>, vector<1x16x16xf32>,
    return
  }
  func.func @transform_0(%arg0: i32, %arg1: i32) -> (i32, i32, i32) {
    %c0_i32 = arith.constant 0 : i32
    %c0_i32_0 = arith.constant 0 : i32
    %c0_i32_1 = arith.constant 0 : i32
    return %arg0, %c0_i32, %c0_i32_0 : i32, i32, i32
  }
  func.func @transform_1(%arg0: i32, %arg1: i32) -> (i32, i32) {
    %c0_i32 = arith.constant 0 : i32
    %c0_i32_0 = arith.constant 0 : i32
    %c0_i32_1 = arith.constant 0 : i32
    return %c0_i32, %c0_i32_0 : i32, i32
  }
  func.func @transform_2(%arg0: i32, %arg1: i32) -> (i32, i32) {
    %c0_i32 = arith.constant 0 : i32
    %c0_i32_0 = arith.constant 0 : i32
    %c0_i32_1 = arith.constant 0 : i32
    return %c0_i32, %c0_i32_0 : i32, i32
  }
  func.func @transform_3(%arg0: i32, %arg1: i32) -> (i32, i32) {
    %c0_i32 = arith.constant 0 : i32
    %c0_i32_0 = arith.constant 0 : i32
    %c0_i32_1 = arith.constant 0 : i32
    return %c0_i32, %c0_i32_0 : i32, i32
  }
  func.func @transform_4(%arg0: i32, %arg1: i32) -> (i32, i32) {
    %c0_i32 = arith.constant 0 : i32
    %c0_i32_0 = arith.constant 0 : i32
    %c0_i32_1 = arith.constant 0 : i32
    return %c0_i32, %c0_i32_0 : i32, i32
  }
  func.func @transform_5(%arg0: i32, %arg1: i32) -> (i32, i32, i32) {
    %c0_i32 = arith.constant 0 : i32
    %c0_i32_0 = arith.constant 0 : i32
    return %arg0, %arg1, %c0_i32 : i32, i32, i32
  }
}

</mosaic_0001>

<bundles_post_ra>
// kernel: tpu_custom_call.1
= control target key start
LH: loop header
LB: loop body
LE: loop exit
PB: predicated region body
PF: predicated region fallthrough
CT: control target
= control target key end

     0   :  { %s948_s18 = smov 0   ;;  %s950_s19 = smov 0   ;;  %s1097_s0 = inlined_call_operand.vmem [shape: f32[2,68,8], index: 0, kind: input, shape index: {}]   ;;  %s1098_s1 = inlined_call_operand.vmem [shape: f32[24,16], index: 1, kind: input, shape index: {}]   ;;  %s1099_s2 = inlined_call_operand.vmem [shape: f32[48,16], index: 2, kind: input, shape index: {}]   ;;  %s1100_s3 = inlined_call_operand.vmem [shape: f32[8,16], index: 3, kind: input, shape index: {}]   ;;  %s1101_s4 = inlined_call_operand.vmem [shape: f32[5,16], index: 4, kind: input, shape index: {}]   ;;  %s1102_s5 = inlined_call_operand.vmem [shape: f32[2,64,16], index: 5, kind: output, shape index: {}]  }
   0x1   :  { %s952_s20 = smov 0   ;;  %s954_s21 = smov 0  }
   0x2   :  { %s956_s22 = smov 0  }
   0x3 LB: > { %s24_s23 = sadd.s32 1, %s902_s20  ;;  %s27_s24 = sadd.s32 1, %s906_s21  ;;  %s910_s22 = sphi %s956_s22, %s15_s22   ;;  %s906_s21 = sphi %s954_s21, %s1106_s21   ;;  %s902_s20 = sphi %s952_s20, %s1105_s20   ;;  %s898_s19 = sphi %s950_s19, %s1104_s19   ;;  %s894_s18 = sphi %s948_s18, %s1103_s18  }
   0x4   : > { %p25_p0 = scmp.ge.s32.totalorder %s24_s23, 4  ;;  %p742_p1 = scmp.ge.s32.totalorder %s910_s22, 1 }
   0x5   : > { %p201_p2 = scmp.lt.s32.totalorder %s910_s22, 9 }
   0x6   : > { %s1108_s23 = smov (%p25_p0, %s24_s23), 0  ;;  %s1110_s24 = smov (!%p25_p0, %s27_s24), %s906_s21 }
   0x7   : > { %p202_p3 = pnand %p742_p1, %p201_p2  ;;  %p29_p4 = scmp.ge.s32.totalorder %s1110_s24, 2 }
   0x8   : > { %p233_p5 = scmp.lt.s32.totalorder (!%p202_p3), %s898_s19, 1  ;;  %v912_v0 = vmov (!%p202_p3), 0.0|0.0   ;;  %v295_v1 = vld [vmem:[%s1098_s1] sm:$0xff] (!%p202_p3)  ;;  %v296_v2 = vld [vmem:[%s1098_s1 + $0x8] sm:$0xff] (!%p202_p3)  ;;  %vm913_vm0 = vmmov (!%p202_p3), 0   ;;  %v914_v4 = vmov (!%p202_p3), 0.0   ;;  %v388_v34 = vlaneseq (!%p202_p3) }
   0x9   : > { %s1112_s24 = smov (%p29_p4, %s1110_s24), 0  ;;  %205 = sbr.rel (%p202_p3) target bundleno = 717 (0x2cd), region = 40 }
   0xa   : > { %810 = vmatprep.subr.bf16.mxu0 (!%p202_p3), %v912_v0  ;;  %v811_v3 = vpack.c.bf16 (!%p202_p3), %v296_v2, %v295_v1  ;;  %781 = vmatprep.mubr.msk.f32.mxu0 (!%p202_p3), %vm913_vm0, %v914_v4  ;;  %s747_s30 = sshll.u32 (!%p202_p3), %s894_s18, 4  ;;  %v297_v5 = vld [vmem:[%s1098_s1 + $0x10] sm:$0xff] (!%p202_p3)  ;;  %vm257_vm1 = vcmask (!%p202_p3), 1046528   ;;  %vm272_vm2 = vcmask (!%p202_p3), 1045504   ;;  %s915_s12 = smov (!%p202_p3), 8   ;;  %vm287_vm3 = vcmask (!%p202_p3), 64512  }
   0xb   : > { %s916_s13 = smov (!%p202_p3), 16   ;;  %vm291_vm4 = vcmask (!%p202_p3), 130048   ;;  %vm298_vm5 = vcmask (!%p202_p3), 195584   ;;  %v462_v31 = vld [vmem:[%s1099_s2] sm:$0xff] (!%p202_p3)  ;;  %v463_v32 = vld [vmem:[%s1099_s2 + $0x8] sm:$0xff] (!%p202_p3)  ;;  %v1026_v35 = vshrl.u32 (!%p202_p3), %v388_v34, 7 }
   0xc   : > { %812 = vmatpush3.bf16.msra.mxu0 (!%p202_p3), %v811_v3  ;;  %v813_v33 = vpack.c.bf16 (!%p202_p3), %v463_v32, %v462_v31  ;;  %s751_s25 = sadd.s32 (!%p202_p3), 4294967295, %s747_s30  ;;  %v1034_v37 = vld [vmem:[%s1101_s4] sm:$0x1f] (!%p202_p3)  ;;  %v464_v47 = vld [vmem:[%s1099_s2 + $0x10] sm:$0xff] (!%p202_p3)  ;;  %v465_v48 = vld [vmem:[%s1099_s2 + $0x18] sm:$0xff] (!%p202_p3)  ;;  %s917_s14 = smov (!%p202_p3), 32  }
   0xd   : > { %779 = vmatprep.subr.mxu0 (!%p202_p3), %v914_v4  ;;  %v390_v36 = vsub.s32 (!%p202_p3), 0, %v1026_v35  ;;  %v397_v38 = vsub.s32 (!%p202_p3), 1, %v1026_v35  ;;  %v410_v39 = vstv (!%p202_p3), %s751_s25  ;;  %v408_v40 = vadd.s32 (!%p202_p3), 8, %v1026_v35  ;;  %v466_v55 = vld [vmem:[%s1099_s2 + $0x20] sm:$0xff] (!%p202_p3)  ;;  %v467_v56 = vld [vmem:[%s1099_s2 + $0x28] sm:$0xff] (!%p202_p3) }
   0xe   : > { %814 = vmatprep.subr.bf16.mxu1 (!%p202_p3), %v813_v33  ;;  %v411_v43 = vadd.s32 (!%p202_p3), %v410_v39, %v1026_v35  ;;  %v409_v46 = vadd.s32 (!%p202_p3), 16, %v1026_v35  ;;  %v817_v51 = vpack.c.bf16 (!%p202_p3), %v465_v48, %v464_v47  ;;  %v821_v60 = vpack.c.bf16 (!%p202_p3), %v467_v56, %v466_v55  ;;  %v564_v3 = vld [vmem:[%s1100_s3] sm:$0xff] (!%p202_p3) }
   0xf   : > { %816 = vmatpush3.bf16.msra.mxu1 (!%p202_p3), %v813_v33  ;;  %v391_v41 = vrot.slane (!%p202_p3), %v1034_v37, %v390_v36  ;;  %v398_v42 = vrot.slane (!%p202_p3), %v1034_v37, %v397_v38  ;;  %v412_v45 = vadd.s32 (!%p202_p3), %v410_v39, %v408_v40  ;;  %vm459_vm15 = vcmask (!%p202_p3), 261120  }
  0x10   : > { %s1114_s19 = smov (!%p233_p5, %s898_s19), 1  ;;  %780 = vmatpush3.msra.mxu0 %v297_v5  ;;  %vm414_vm6 = vcmp.ge.s32.totalorder %v411_v43, 0  ;;  %vm417_vm7 = vcmp.lt.s32.totalorder %v411_v43, 64  ;;  %818 = vmatprep.subr.bf16.mxu1 %v817_v51  ;;  %v413_v54 = vadd.s32 %v410_v39, %v409_v46  ;;  %v567_v31 = vsub.s32 4, %v1026_v35 }
  0x11   : > { %s825_s29 = smul.u32 72, %s1114_s19  ;;  %vm415_vm8 = vcmp.ge.s32.totalorder %v412_v45, 0  ;;  %vm418_vm9 = vcmp.lt.s32.totalorder %v412_v45, 64  ;;  %vm420_vm10 = vmand %vm414_vm6, %vm417_vm7  ;;  %s745_s15 = sshll.u32 %s1114_s19, 3 }
  0x12   : > { %vm421_vm11 = vmand %vm415_vm8, %vm418_vm9  ;;  %vm416_vm12 = vcmp.ge.s32.totalorder %v413_v54, 0  ;;  %vm419_vm13 = vcmp.lt.s32.totalorder %v413_v54, 64 }
  0x13   : > { %s237_s10 = scalar_lea.vmem %s1097_s0, %s825_s29  ;;  %820 = vmatpush3.bf16.msra.mxu1 %v817_v51  ;;  %vm422_vm14 = vmand %vm416_vm12, %vm419_vm13 }
  0x14   : > { %s250_s11 = scalar_lea.vmem %s237_s10, %s747_s30  ;;  %822 = vmatprep.subr.bf16.mxu1 %v821_v60 }
  0x15   : > { %v251_v6 = vld [vmem:[%s250_s11] sm:$0xff]  ;;  %v252_v7 = vld [vmem:[%s250_s11 + $0x8] sm:$0xff]  ;;  %v253_v8 = vld [vmem:[%s250_s11 + $0x10] sm:$0xf] }
  0x16   : > { %v258_v9 = vrot.slane %v251_v6, 1  ;;  %v259_v10 = vrot.slane %v252_v7, 1  ;;  %v261_v11 = vrot.slane %v253_v8, 1  ;;  %v273_v12 = vrot.slane %v251_v6, 2 }
  0x17   : > { %v274_v13 = vrot.slane %v252_v7, 2  ;;  %v276_v14 = vrot.slane %v253_v8, 2  ;;  %824 = vmatpush3.bf16.msra.mxu1 %v821_v60 }
  0x18   : > { %v260_v15 = vsel %vm257_vm1, %v258_v9, %v259_v10  ;;  %v262_v16 = vsel %vm257_vm1, %v259_v10, %v261_v11  ;;  %805 = vmatprep.subr.mxu1 %v564_v3 }
  0x19   : > { %263 = vrot.lane.b32.xlu0 %v260_v15, %s915_s12  ;;  %265 = vrot.lane.b32.xlu1 %v262_v16, %s915_s12  ;;  %v1002_v17 = vsel %vm272_vm2, %v273_v12, %v274_v13  ;;  %v1005_v18 = vsel %vm272_vm2, %v274_v13, %v276_v14 }
  0x1d   : > { %278 = vrot.lane.b32.xlu0 %v1002_v17, %s916_s13  ;;  %280 = vrot.lane.b32.xlu1 %v1005_v18, %s916_s13 }
  0x21   : > { %267 = vrot.lane.b32.xlu0 %v261_v11, %s915_s12  ;;  %282 = vrot.lane.b32.xlu1 %v276_v14, %s916_s13 }
  0x8b   : > { %v264_v19 = vpop.permute.xlu0 %263  ;;  %v266_v20 = vpop.permute.xlu1 %265 }
  0x8c   : > { %v288_v21 = vsel %vm287_vm3, %v251_v6, %v264_v19  ;;  %v289_v25 = vsel %vm287_vm3, %v252_v7, %v266_v20 }
  0x8f   : > { %v279_v22 = vpop.permute.xlu0 %278  ;;  %v281_v23 = vpop.permute.xlu1 %280 }
  0x90   : > { %v292_v24 = vsel %vm291_vm4, %v288_v21, %v279_v22  ;;  %v293_v28 = vsel %vm291_vm4, %v289_v25, %v281_v23 }
  0x91   : > { %782 = vmatmul.mubr.msk.f32.vlgmr.msra.gmra.mrb[0].mxu0 %vm298_vm5, %v292_v24 }
  0x92   : > { %784 = vmatprep.mubr.msk.f32.mxu0 %vm913_vm0, %v914_v4 }
  0x93   : > { %v268_v26 = vpop.permute.xlu0 %267  ;;  %v283_v27 = vpop.permute.xlu1 %282 }
  0x94   : > { %v290_v29 = vsel %vm287_vm3, %v253_v8, %v268_v26 }
  0x95   : > { %785 = vmatmul.mubr.msk.f32.gmra.mrb[2].mxu0 %vm298_vm5, %v293_v28  ;;  %v294_v30 = vsel %vm291_vm4, %v290_v29, %v283_v27  ;;  %v552_v28 = vsub.s32 2, %v1026_v35  ;;  %v558_v29 = vsub.s32 3, %v1026_v35 }
  0x96   : > { %787 = vmatprep.mubr.msk.f32.mxu0 %vm913_vm0, %v914_v4  ;;  %vm468_vm0 = vcmask 392192  }
  0x97   : > { %v559_v32 = vrot.slane %v1034_v37, %v558_v29 }
  0x99   : > { %788 = vmatmul.mubr.msk.f32.gmra.mrb[4].mxu0 %vm298_vm5, %v294_v30  ;;  %v553_v30 = vrot.slane %v1034_v37, %v552_v28 }
 0x164   : > { %v374_v44 = vpop.f32.mrb[0].mxu0 }
 0x165   : > { %v392_v49 = vmul.f32 %v391_v41, %v374_v44  ;;  %v783_v50 = vpop.f32.mrb[1].mxu0 }
 0x167   : > { %v399_v52 = vadd.f32 %v398_v42, %v392_v49 }
 0x168   : > { %v379_v53 = vpop.f32.mrb[2].mxu0 }
 0x169   : > { %v402_v57 = vmax.f32 %v399_v52, 0.0  ;;  %v393_v58 = vmul.f32 %v391_v41, %v379_v53  ;;  %v786_v59 = vpop.f32.mrb[3].mxu0 }
 0x16b   : > { %v400_v61 = vadd.f32 %v398_v42, %v393_v58  ;;  %v429_v63 = vsel %vm420_vm10, %v402_v57, 0.0 }
 0x16c   : > { %v384_v62 = vpop.f32.mrb[4].mxu0  ;;  %v435_v6 = vrot.slane %v429_v63, 1  ;;  %v446_v13 = vrot.slane %v429_v63, 2 }
 0x16d   : > { %v403_v0 = vmax.f32 %v400_v61, 0.0  ;;  %v394_v1 = vmul.f32 %v391_v41, %v384_v62  ;;  %v789_v2 = vpop.f32.mrb[5].mxu0 }
 0x16f   : > { %v430_v4 = vsel %vm421_vm11, %v403_v0, 0.0  ;;  %v401_v5 = vadd.f32 %v398_v42, %v394_v1 }
 0x170   : > { %v436_v7 = vrot.slane %v430_v4, 1  ;;  %v447_v10 = vrot.slane %v430_v4, 2 }
 0x171   : > { %v404_v8 = vmax.f32 %v401_v5, 0.0 }
 0x172   : > { %v437_v9 = vsel %vm257_vm1, %v435_v6, %v436_v7  ;;  %v448_v15 = vsel %vm272_vm2, %v446_v13, %v447_v10 }
 0x173   : > { %v431_v11 = vsel %vm422_vm14, %v404_v8, 0.0  ;;  %440 = vrot.lane.b32.xlu0 %v437_v9, %s916_s13 }
 0x174   : > { %v438_v12 = vrot.slane %v431_v11, 1  ;;  %v449_v14 = vrot.slane %v431_v11, 2 }
 0x176   : > { %v439_v16 = vsel %vm257_vm1, %v436_v7, %v438_v12  ;;  %v450_v19 = vsel %vm272_vm2, %v447_v10, %v449_v14 }
 0x177   : > { %451 = vrot.lane.b32.xlu0 %v448_v15, %s917_s14  ;;  %442 = vrot.lane.b32.xlu1 %v439_v16, %s916_s13  ;;  %s744_s13 = sshll.u32 %s894_s18, 1 }
 0x178   : > { %p241_p6 = scmp.lt.s32.totalorder %s744_s13, 7 }
 0x17a   : > { %s1116_s13 = smov (!%p241_p6, %s744_s13), 7 }
 0x17b   : > { %453 = vrot.lane.b32.xlu1 %v450_v19, %s917_s14  ;;  %s244_s16 = sadd.s32 %s745_s15, %s1116_s13 }
 0x17c   : > { %s746_s18 = sshll.u32 %s244_s16, 3 }
 0x17d   : > { %s246_s25 = scalar_lea.vmem %s1102_s5, %s746_s18 }
 0x1e5   : > { %v441_v20 = vpop.permute.xlu0 %440 }
 0x1e6   : > { %v457_v21 = vsel %vm291_vm4, %v429_v63, %v441_v20 }
 0x1e9   : > { %v443_v22 = vpop.permute.xlu1 %442  ;;  %v452_v23 = vpop.permute.xlu0 %451 }
 0x1ea   : > { %v460_v24 = vsel %vm459_vm15, %v457_v21, %v452_v23  ;;  %v458_v25 = vsel %vm291_vm4, %v430_v4, %v443_v22 }
 0x1eb   : > { %802 = vmatprep.mubr.msk.f32.mxu1 %vm468_vm0, %v460_v24 }
 0x1ed   : > { %v454_v26 = vpop.permute.xlu1 %453 }
 0x1ee   : > { %v461_v27 = vsel %vm459_vm15, %v458_v25, %v454_v26 }
 0x1ef   : > { %803 = vmatmul.mubr.msk.f32.vlgmr.msra.gmra.mrb[0].mxu1 %vm468_vm0, %v461_v27 }
 0x1f0   : > { %806 = vmatpush3.msra.mxu1 %v564_v3  ;;  %807 = vmatprep.mubr.msk.f32.mxu1 %vm287_vm3, %v1002_v17 }
 0x1f3   : > { %808 = vmatmul.mubr.msk.f32.vlgmr.msra.gmra.mrb[2].mxu1 %vm287_vm3, %v1005_v18  ;;  %v568_v18 = vrot.slane %v1034_v37, %v567_v31 }
 0x2c2   : > { %v804_v33 = vpop.f32.mrb[0].mxu1 }
 0x2c3   : > { %v555_v17 = vmul.f32 %v804_v33, %v553_v30  ;;  %v541_v34 = vpop.f32.mrb[1].mxu1 }
 0x2c4   : > { %v554_v36 = vmul.f32 %v553_v30, %v541_v34 }
 0x2c5   : > { %v561_v38 = vadd.f32 %v559_v32, %v555_v17 }
 0x2c6   : > { %v560_v39 = vadd.f32 %v559_v32, %v554_v36  ;;  %v809_v40 = vpop.f32.mrb[2].mxu1 }
 0x2c7   : > { %v563_v41 = vmax.f32 %v561_v38, 0.0  ;;  %v645_v42 = vadd.f32 %v809_v40, %v568_v18  ;;  %v639_v43 = vpop.f32.mrb[3].mxu1 }
 0x2c8   : > { %v562_v44 = vmax.f32 %v560_v39, 0.0  ;;  %v640_v35 = vadd.f32 %v639_v43, %v568_v18 }
 0x2c9   : > { %v649_v45 = vadd.f32 %v645_v42, %v563_v41 }
 0x2ca   : > { %v648_v46 = vadd.f32 %v640_v35, %v562_v44 }
 0x2cb   : > { %651 = vst.msk [vmem:[%s246_s25 + $0x8] sm:$0xff] %vm291_vm4, %v649_v45 }
 0x2cc   : > { %650 = vst.msk [vmem:[%s246_s25] sm:$0xff] %vm291_vm4, %v648_v46 }
 0x2cd PF: > { %s15_s22 = sadd.s32 1, %s910_s22   ;;  %s1103_s18 = smov %s902_s20 }
 0x2ce   : > { %p12_p7 = scmp.ge.s32.totalorder %s15_s22, 10   ;;  %s1104_s19 = smov %s906_s21 }
 0x2cf   : > { %s1105_s20 = smov %s1108_s23  ;;  %s1106_s21 = smov %s1112_s24 }
 0x2d0   :  { %14 = sbr.rel (!%p12_p7) target bundleno = 3 (0x3), region = 71 }

</bundles_post_ra>
